<compile_context>
chip_gen: v5e
topology: v5e:2x2
jax: 0.10.0
libtpu: 0.0.40
codegen_flags: <defaults>
</compile_context>

<pallas_src>
import jax
import jax.numpy as jnp
import numpy as np
from jax.experimental import pallas as pl
from jax.experimental.pallas import tpu as pltpu


def _copy_kernel(x_ref, o_ref):
    # Pure pass-through of the current lane-dense tile.
    o_ref[...] = x_ref[...]


def identity(x: jax.Array) -> jax.Array:
    """Identity forward pass (recommended path): return the input unchanged."""
    return x


def _round_up(a: int, b: int) -> int:
    return ((a + b - 1) // b) * b


def _tpu_sizing(itemsize: int):
    """Generation-aware (tile bytes, vmem limit) and dtype-aware sublane multiple."""
    try:
        vmem_cap = int(pltpu.get_tpu_info().vmem_capacity_bytes)
    except Exception:
        vmem_cap = 128 << 20
    if vmem_cap <= (64 << 20):           # v7x: 64 MiB VMEM per TensorCore
        target_block_bytes = 8 << 20     # 4x (in+out, double-buffered) = 32 MiB
        vmem_limit_bytes = 40 << 20      # headroom below 64 MiB physical
    else:                                # v5e / v6e: 128 MiB physical VMEM
        target_block_bytes = 16 << 20
        vmem_limit_bytes = 64 << 20
    # Narrow dtypes pack along sublanes: 8 rows f32, 16 bf16/f16, 32 int8/fp8.
    sublane = 8 * max(1, 4 // max(1, int(itemsize)))
    return target_block_bytes, vmem_limit_bytes, sublane


def identity_copy(x: jax.Array, *, donate: bool = False) -> jax.Array:
    """Identity through an explicit Pallas kernel boundary (HBM-bound copy)."""
    orig_shape = x.shape
    total = int(x.size)
    if total == 0:
        return x

    itemsize = jnp.dtype(x.dtype).itemsize
    target_block_bytes, vmem_limit_bytes, sublane = _tpu_sizing(itemsize)
    alias = {0: 0} if donate else {}
    params = pltpu.CompilerParams(
        dimension_semantics=("parallel",),   # shards grid steps across v7x's 2 TCs
        vmem_limit_bytes=vmem_limit_bytes,
    )

    # Pick the widest lane-dense last dim (multiple of 128) dividing `total`.
    lanes = None
    for w in (4096, 2048, 1024, 512, 256, 128):
        if total % w == 0:
            lanes = w
            break

    if lanes is None:
        # `total` not a multiple of 128: tile the flat (1, total) view along
        # lanes with a cdiv grid; the partial last block is masked by Pallas.
        flat = x.reshape(1, total)
        if total < 128:
            block_l = total                          # full-dims block (legal)
        else:
            block_l = min((target_block_bytes // itemsize) // 128 * 128,
                          (total // 128) * 128)
            block_l = max(128, block_l)
        grid = (pl.cdiv(total, block_l),)
        out = pl.pallas_call(
            _copy_kernel,
            out_shape=jax.ShapeDtypeStruct(flat.shape, flat.dtype),
            grid=grid,
            in_specs=[pl.BlockSpec((1, block_l), lambda i: (0, i))],
            out_specs=pl.BlockSpec((1, block_l), lambda i: (0, i)),
            input_output_aliases=alias,
            compiler_params=params,
        )(flat)
        return out.reshape(orig_shape)

    rows = total // lanes
    flat = x.reshape(rows, lanes)

    if rows <= sublane:
        # Tiny slab: one block equal to the full array dims (always legal).
        block_rows = rows
    else:
        # Fixed large sublane-aligned block; cdiv grid masks the partial tail.
        cap_rows = max(sublane,
                       (target_block_bytes // (lanes * itemsize)) // sublane * sublane)
        block_rows = min(cap_rows, _round_up(rows, sublane))
        # Guarantee >= 2 grid steps so both v7x TensorCores issue copy DMAs.
        if pl.cdiv(rows, block_rows) < 2:
            block_rows = max(sublane, _round_up(pl.cdiv(rows, 2), sublane))

    grid = (pl.cdiv(rows, block_rows),)
    out = pl.pallas_call(
        _copy_kernel,
        out_shape=jax.ShapeDtypeStruct(flat.shape, flat.dtype),
        grid=grid,
        in_specs=[pl.BlockSpec((block_rows, lanes), lambda i: (i, 0))],
        out_specs=pl.BlockSpec((block_rows, lanes), lambda i: (i, 0)),
        input_output_aliases=alias,
        compiler_params=params,
    )(flat)
    return out.reshape(orig_shape)


if __name__ == "__main__":
    key = jax.random.PRNGKey(0)

    # Small NCHW tensor consistent with the module: N=2, C=4, H=W=16.
    x = jax.random.normal(key, (2, 4, 16, 16), dtype=jnp.float32)
    x_np = np.asarray(jax.device_get(x))

    # Fast path (the recommended production implementation).
    z = identity(x)
    assert z is x

    # Kernel-boundary path on the module-consistent shape.
    y = identity_copy(x)
    jax.block_until_ready(y)
    assert y.shape == x.shape and y.dtype == x.dtype
    assert np.array_equal(np.asarray(jax.device_get(y)), x_np)

    # Extra robustness checks (small): awkward, non-128-multiple total and a
    # multi-row slab with a masked partial last block.
    k1, k2 = jax.random.split(key)
    a = jax.random.normal(k1, (4, 130), dtype=jnp.float32)      # 520 elems
    a_np = np.asarray(jax.device_get(a))
    ya = identity_copy(a)
    jax.block_until_ready(ya)
    assert np.array_equal(np.asarray(jax.device_get(ya)), a_np)

    b = jax.random.normal(k2, (40, 2048), dtype=jnp.float32)    # rows=20, partial tile
    b_np = np.asarray(jax.device_get(b))
    yb = identity_copy(b)
    jax.block_until_ready(yb)
    assert np.array_equal(np.asarray(jax.device_get(yb)), b_np)

    print("KERNEL_OK")
</pallas_src>

<mosaic_0001>
module attributes {stable_mosaic.version = 11 : i64} {
  func.func @_copy_kernel(%arg0: i32, %arg1: memref<1x2048xf32, #tpu.memory_space<vmem>>, %arg2: memref<1x2048xf32, #tpu.memory_space<vmem>>) attributes {dimension_semantics = [#tpu.dimension_semantics<parallel>], iteration_bounds = array<i64: 1>, scalar_prefetch = 0 : i64, scratch_operands = 0 : i64, tpu.core_type = #tpu.core_type<tc>, window_params = [{transform_indices = @transform_0, window_bounds = array<i64: 1, 2048>}, {transform_indices = @transform_1, window_bounds = array<i64: 1, 2048>}]} {
    %c0 = arith.constant 0 : index
    %c0_0 = arith.constant 0 : index
    %0 = vector.load %arg1[%c0, %c0_0] : memref<1x2048xf32, #tpu.memory_space<vmem>>, vector<1x2048xf32>
    %c0_1 = arith.constant 0 : index
    %c0_2 = arith.constant 0 : index
    %1 = vector.load %arg2[%c0_1, %c0_2] : memref<1x2048xf32, #tpu.memory_space<vmem>>, vector<1x2048xf32>
    tpu.vector_store %arg2[%c0_1, %c0_2], %0 {strides = array<i32>} : memref<1x2048xf32, #tpu.memory_space<vmem>>, vector<1x2048xf32>,
    return
  }
  func.func @transform_0(%arg0: i32) -> (i32, i32) {
    %c0_i32 = arith.constant 0 : i32
    %c0_i32_0 = arith.constant 0 : i32
    return %arg0, %c0_i32 : i32, i32
  }
  func.func @transform_1(%arg0: i32) -> (i32, i32) {
    %c0_i32 = arith.constant 0 : i32
    %c0_i32_0 = arith.constant 0 : i32
    return %arg0, %c0_i32 : i32, i32
  }
}

</mosaic_0001>

<bundles_post_ra>
// kernel: tpu_custom_call.1
= control target key start
LH: loop header
LB: loop body
LE: loop exit
PB: predicated region body
PF: predicated region fallthrough
CT: control target
= control target key end

     0   :  { %6 = vsyncpa [#allocation3], 0  ;;  %s116_s0 = inlined_call_operand.hbm [shape: f32[1,2048], index: 0, kind: input, shape index: {}]   ;;  %s117_s1 = inlined_call_operand.hbm [shape: f32[1,2048], index: 1, kind: output, shape index: {}]  }
   0x1   :  { %7 = vsyncpa [#allocation4], 0  ;;  %s13_s8 = sshll.u32 %s116_s0, 4  ;;  %s98_s9 = smov [#allocation2]   ;;  %s14_s8 = int_to_ptr.hbm [resolvable:$true] %s13_s8 }
   0x2   :  { %s15_s10 = sshll.u32 %s98_s9, 4  ;;  %s16_s10 = int_to_ptr.vmem [resolvable:$true] %s15_s10 }
   0x3   :  { %18 = dma.hbm_to_vmem [thread:$0]  %s14_s8, 256, %s16_s10, [#allocation3]  }
   0x4   :  { %94 = dma.done.wait [#allocation3], 256  }
   0x5   :  { %95 = vsyncadd [#allocation3], 4294967040  ;;  %s99_s11 = smov [#allocation5]   ;;  %s34_s15 = sshll.u32 %s117_s1, 4  ;;  %v23_v0 = vld [vmem:[#allocation2] sm:$0xff]  ;;  %v24_v1 = vld [vmem:[#allocation2 + $0x8] sm:$0xff]  ;;  %s35_s15 = int_to_ptr.hbm [resolvable:$true] %s34_s15 }
   0x6   :  { %s32_s12 = sshll.u32 %s99_s11, 4  ;;  %25 = vst [vmem:[#allocation5] sm:$0xff] %v23_v0  ;;  %s33_s12 = int_to_ptr.vmem [resolvable:$true] %s32_s12 }
   0x7   :  { %26 = vst [vmem:[#allocation5 + $0x8] sm:$0xff] %v24_v1 }
   0x8   :  { %37 = dma.vmem_to_hbm [thread:$0]  %s33_s12, 256, %s35_s15, [#allocation4]  }
   0x9   :  { %96 = dma.done.wait [#allocation4], 256  }
   0xa   :  { %97 = vsyncadd [#allocation4], 4294967040 }
   0xb   :  { %42 = vsyncpa [#allocation3], 1 }
   0xc   :  { %43 = vsyncpa [#allocation4], 1 }

</bundles_post_ra>
